<compile_context>
chip_gen: v7x
topology: tpu7x:2x2x1
jax: 0.10.0
libtpu: 0.0.40
codegen_flags: <defaults>
</compile_context>

<pallas_src>
import functools
import numpy as np
import jax
import jax.numpy as jnp
from jax.experimental import pallas as pl
from jax.experimental.pallas import tpu as pltpu


def _round_up(x, m):
    return ((x + m - 1) // m) * m


# ----------------------------------------------------------------------------
# Kernel: score a tile of TN sequences from their last-token embeddings.
#   w1t : (Hp, Hp) bf16   frozen body weight, transposed (grid-invariant)
#   xt  : (Hp, TN) bf16   last-token embeddings, transposed (rows on lanes)
#   bw  : (Hp, 2)  f32    column 0 = frozen body bias, column 1 = score head w
#   out : (1,  TN) f32    per-row scores, lane-dense (unmasked stores)
# ----------------------------------------------------------------------------
def score_kernel(w1t_ref, xt_ref, bw_ref, out_ref):
    b1 = bw_ref[:, 0:1]                                      # (Hp, 1) f32
    ws = bw_ref[:, 1:2]                                      # (Hp, 1) f32
    ht = jnp.tanh(
        jnp.dot(w1t_ref[...], xt_ref[...], preferred_element_type=jnp.float32)
        + b1
    )                                                        # (Hp, TN) f32
    # (H,1) score head on VPU + sublane reduce (MXU would use 1/256 width);
    # result is already lane-dense (1, TN).
    out_ref[...] = jnp.sum(ht * ws, axis=0, keepdims=True)


def _choose_row_tile(N, Hp):
    """Row tile (lanes): big enough to amortize the ~0.35us/step pipeline
    overhead, capped so per-step VMEM stays well inside the default scoped
    limit on every generation (v7x: 32 MiB default / 64 MiB physical)."""
    budget = 28 * 1024 * 1024
    fixed = Hp * Hp * 2 + 2 * Hp * 128 * 4          # W1^T (1 buf) + lane-padded consts
    per_col = 2 * Hp * 2 + Hp * 4 + 2 * 4           # x tile (2 bufs bf16) + f32 temp + out
    cap = max(128, ((budget - fixed) // per_col) // 128 * 128)
    return int(min(1024, cap, _round_up(max(N, 1), 128)))


def score_pallas(x_last_bf16, W1, b1, Ws):
    """x_last_bf16: (N, H) bf16 last-token embeddings -> scores (N,) f32."""
    N, H = x_last_bf16.shape
    Hp = _round_up(H, 128)                       # lane-aligned hidden dim
    TN = _choose_row_tile(N, Hp)                 # 128..1024, VMEM-budgeted
    Np = _round_up(N, TN)

    # Zero-padded, transposed MXU inputs (jnp.pad fuses better than .at[].set).
    # Padding is exact: padded H rows/cols contribute nothing to the scores;
    # padded row-columns are sliced off below.
    xt = jnp.pad(x_last_bf16.T, ((0, Hp - H), (0, Np - N)))              # (Hp, Np) bf16
    w1t = jnp.pad(W1.T.astype(jnp.bfloat16), ((0, Hp - H), (0, Hp - H)))  # (Hp, Hp) bf16
    bw = jnp.pad(
        jnp.concatenate([b1.reshape(H, 1), Ws.reshape(H, 1)], axis=1)
        .astype(jnp.float32),
        ((0, Hp - H), (0, 0)))                                           # (Hp, 2)  f32

    cost = pl.CostEstimate(
        flops=2 * Np * Hp * Hp + 2 * Np * Hp,
        transcendentals=Np * Hp,
        bytes_accessed=2 * Hp * Np + 2 * Hp * Hp + 4 * 2 * Hp + 4 * Np,
    )

    def build(single_buffer_invariants):
        inv = {"pipeline_mode": pl.Buffered(1)} if single_buffer_invariants else {}
        in_specs = [
            pl.BlockSpec((Hp, Hp), lambda i: (0, 0), **inv),   # W1^T (grid-invariant)
            pl.BlockSpec((Hp, TN), lambda i: (0, i)),          # x^T  row tile
            pl.BlockSpec((Hp, 2), lambda i: (0, 0), **inv),    # [b1 | ws] constants
        ]
        return pl.pallas_call(
            score_kernel,
            out_shape=jax.ShapeDtypeStruct((1, Np), jnp.float32),
            grid=(Np // TN,),
            in_specs=in_specs,
            out_specs=pl.BlockSpec((1, TN), lambda i: (0, i)),
            compiler_params=pltpu.CompilerParams(
                dimension_semantics=("parallel",)),             # megacore on v7x
            cost_estimate=cost,
        )

    try:
        out = build(True)(w1t, xt, bw)          # single-buffer invariant blocks
    except Exception:
        # pipeline_mode=pl.Buffered(1) unsupported on this jax -> default
        # double buffering (correct, slightly more VMEM for the weight).
        out = build(False)(w1t, xt, bw)
    return out[0, :N]


def reward_forward(flat_ids, pad_id, emb_bf16, W1, b1, Ws, best, B, K):
    """Returns (loss_scalar, scores[B, K])."""
    N, S = flat_ids.shape
    # Last non-pad token per row (clamped so an all-pad row pools position 0).
    n_valid = jnp.sum((flat_ids != pad_id).astype(jnp.int32), axis=1)
    last = jnp.maximum(n_valid - 1, 0)
    last_tok = flat_ids[jnp.arange(N), last]                 # (N,)
    x_last = emb_bf16[last_tok]                              # (N, H) bf16 gather

    scores = score_pallas(x_last, W1, b1, Ws).reshape(B, K)

    # Preference loss over a tiny (B, K) array: plain JAX / XLA.
    sel = jnp.take_along_axis(scores, best[:, None], axis=1)[:, 0]
    lse = jax.scipy.special.logsumexp(scores, axis=1)
    loss = jnp.mean(lse - sel)
    return loss, scores


# ----------------------------------------------------------------------------
# Glue: _combine_query_sample equivalent (remove pad gap between query/sample)
# ----------------------------------------------------------------------------
def combine_query_sample(query, sample, pad_id):
    cat = jnp.concatenate([query, sample])                   # (Lq + Ls,)
    seg = jnp.concatenate([jnp.zeros_like(query), jnp.ones_like(sample)])
    key = jnp.where(cat == pad_id, 2, seg)                   # q-valid < s-valid < pad
    order = jnp.argsort(key)                                 # stable sort
    return cat[order]


# ----------------------------------------------------------------------------
# Pure-JAX f32 reference (full-sequence dense body, pool last token).
# ----------------------------------------------------------------------------
def reference_forward(flat_ids, pad_id, emb, W1, b1, Ws, best, B, K):
    N, S = flat_ids.shape
    H = emb.shape[1]
    mask = (flat_ids != pad_id)
    x = emb[flat_ids].astype(jnp.float32)                    # (N, S, H)
    h = jnp.tanh(x.reshape(N * S, H) @ W1 + b1).reshape(N, S, H)
    last = jnp.maximum(mask.sum(axis=1).astype(jnp.int32) - 1, 0)
    pooled = h[jnp.arange(N), last]                          # (N, H)
    scores = (pooled @ Ws).reshape(B, K)
    sel = scores[jnp.arange(B), best]
    lse = jax.scipy.special.logsumexp(scores, axis=1)
    return jnp.mean(lse - sel), scores


if __name__ == "__main__":
    # ---- small deterministic configuration ----
    B, K, L, H, vocab, pad_id = 2, 4, 8, 128, 64, 0
    S, N = 2 * L, B * K

    key = jax.random.PRNGKey(0)
    kq, ks, ke, k1, kb, kw = jax.random.split(key, 6)

    # query / sample token ids with trailing pads
    pos = jnp.arange(L)
    q_lens = jnp.array([5, 3])
    q_tok = jax.random.randint(kq, (B, L), 1, vocab)
    query_ids = jnp.where(pos[None, :] < q_lens[:, None], q_tok, pad_id)

    s_lens = jnp.array([[4, 6], [2, 7], [5, 3], [8, 4]])     # (K, B)
    s_tok = jax.random.randint(ks, (K, B, L), 1, vocab)
    samples_ids = jnp.where(pos[None, None, :] < s_lens[:, :, None], s_tok, pad_id)

    best = jnp.array([2, 0], dtype=jnp.int32)                # (B,)

    # deterministic "model" parameters
    emb = 0.02 * jax.random.normal(ke, (vocab, H), dtype=jnp.float32)
    W1 = jax.random.normal(k1, (H, H), dtype=jnp.float32) / jnp.sqrt(H)
    b1 = 0.01 * jax.random.normal(kb, (1, H), dtype=jnp.float32)
    Ws = jax.random.normal(kw, (H, 1), dtype=jnp.float32) / jnp.sqrt(H)
    emb_bf16 = emb.astype(jnp.bfloat16)                      # half-width gather path

    # combine query + each sample (row order: b-major, k-minor, matching
    # scores.view(batch, sample_size) in the PyTorch module)
    samp_bk = samples_ids.transpose(1, 0, 2)                 # (B, K, L)
    comb_fn = functools.partial(combine_query_sample, pad_id=pad_id)
    combined = jax.vmap(jax.vmap(comb_fn, in_axes=(None, 0)),
                        in_axes=(0, 0))(query_ids, samp_bk)  # (B, K, S)
    flat_ids = combined.reshape(N, S)

    # ---- run Pallas scoring kernel + JAX loss ----
    loss, scores = reward_forward(flat_ids, pad_id, emb_bf16, W1, b1, Ws, best, B, K)
    loss = jax.block_until_ready(loss)
    scores = jax.block_until_ready(scores)

    # ---- sanity check vs pure-JAX f32 reference (bf16 MXU inputs -> loose tol)
    loss_ref, scores_ref = reference_forward(flat_ids, pad_id, emb, W1, b1, Ws, best, B, K)
    assert np.allclose(np.asarray(scores), np.asarray(scores_ref), atol=1e-2, rtol=1e-2)
    assert np.allclose(float(loss), float(loss_ref), atol=1e-2, rtol=1e-2)

    print("KERNEL_OK")
</pallas_src>

<mosaic_0001>
module attributes {stable_mosaic.version = 11 : i64} {
  func.func @score_kernel(%arg0: i32, %arg1: memref<128x128xbf16, #tpu.memory_space<vmem>>, %arg2: memref<128x128xbf16, #tpu.memory_space<vmem>>, %arg3: memref<128x2xf32, #tpu.memory_space<vmem>>, %arg4: memref<1x128xf32, #tpu.memory_space<vmem>>) attributes {dimension_semantics = [#tpu.dimension_semantics<parallel>], iteration_bounds = array<i64: 1>, scalar_prefetch = 0 : i64, scratch_operands = 0 : i64, tpu.core_type = #tpu.core_type<tc>, window_params = [{pipeline_mode = #tpu.pipeline_mode<synchronous>, transform_indices = @transform_0, window_bounds = array<i64: 128, 128>}, {transform_indices = @transform_1, window_bounds = array<i64: 128, 128>}, {pipeline_mode = #tpu.pipeline_mode<synchronous>, transform_indices = @transform_2, window_bounds = array<i64: 128, 2>}, {transform_indices = @transform_3, window_bounds = array<i64: 1, 128>}]} {
    %c0 = arith.constant 0 : index
    %c0_0 = arith.constant 0 : index
    %0 = vector.load %arg3[%c0, %c0_0] : memref<128x2xf32, #tpu.memory_space<vmem>>, vector<128x1xf32>
    %c0_1 = arith.constant 0 : index
    %c1 = arith.constant 1 : index
    %1 = vector.load %arg3[%c0_1, %c1] : memref<128x2xf32, #tpu.memory_space<vmem>>, vector<128x1xf32>
    %c0_2 = arith.constant 0 : index
    %c0_3 = arith.constant 0 : index
    %2 = vector.load %arg1[%c0_2, %c0_3] : memref<128x128xbf16, #tpu.memory_space<vmem>>, vector<128x128xbf16>
    %c0_4 = arith.constant 0 : index
    %c0_5 = arith.constant 0 : index
    %3 = vector.load %arg2[%c0_4, %c0_5] : memref<128x128xbf16, #tpu.memory_space<vmem>>, vector<128x128xbf16>
    %cst = arith.constant dense<0.000000e+00> : vector<128x128xf32>
    %4 = tpu.matmul %2, %3, %cst {dimension_numbers = #tpu.dot_dimension_numbers<[1], [0], [0], [1], [0, 0, 1, 1], [], []>} : vector<128x128xbf16>, vector<128x128xbf16>, vector<128x128xf32> -> vector<128x128xf32>
    %5 = vector.broadcast %0 : vector<128x1xf32> to vector<128x128xf32>
    %6 = arith.addf %4, %5 : vector<128x128xf32>
    %7 = math.tanh %6 : vector<128x128xf32>
    %8 = vector.broadcast %1 : vector<128x1xf32> to vector<128x128xf32>
    %9 = arith.mulf %7, %8 : vector<128x128xf32>
    %cst_6 = arith.constant dense<0.000000e+00> : vector<128xf32>
    %10 = vector.multi_reduction <add>, %9, %cst_6 [0] : vector<128x128xf32> to vector<128xf32>
    %11 = vector.shape_cast %10 : vector<128xf32> to vector<1x128xf32>
    %c0_7 = arith.constant 0 : index
    %c0_8 = arith.constant 0 : index
    %12 = vector.load %arg4[%c0_7, %c0_8] : memref<1x128xf32, #tpu.memory_space<vmem>>, vector<1x128xf32>
    tpu.vector_store %arg4[%c0_7, %c0_8], %11 {strides = array<i32>} : memref<1x128xf32, #tpu.memory_space<vmem>>, vector<1x128xf32>,
    return
  }
  func.func @transform_0(%arg0: i32) -> (i32, i32) {
    %c0_i32 = arith.constant 0 : i32
    %c0_i32_0 = arith.constant 0 : i32
    %c0_i32_1 = arith.constant 0 : i32
    return %c0_i32, %c0_i32_0 : i32, i32
  }
  func.func @transform_1(%arg0: i32) -> (i32, i32) {
    %c0_i32 = arith.constant 0 : i32
    %c0_i32_0 = arith.constant 0 : i32
    return %c0_i32, %arg0 : i32, i32
  }
  func.func @transform_2(%arg0: i32) -> (i32, i32) {
    %c0_i32 = arith.constant 0 : i32
    %c0_i32_0 = arith.constant 0 : i32
    %c0_i32_1 = arith.constant 0 : i32
    return %c0_i32, %c0_i32_0 : i32, i32
  }
  func.func @transform_3(%arg0: i32) -> (i32, i32) {
    %c0_i32 = arith.constant 0 : i32
    %c0_i32_0 = arith.constant 0 : i32
    return %c0_i32, %arg0 : i32, i32
  }
}

module attributes {stable_mosaic.version = 11 : i64} {
  func.func @score_kernel(%arg0: i32, %arg1: memref<128x128xbf16, #tpu.memory_space<vmem>>, %arg2: memref<128x128xbf16, #tpu.memory_space<vmem>>, %arg3: memref<128x2xf32, #tpu.memory_space<vmem>>, %arg4: memref<1x128xf32, #tpu.memory_space<vmem>>) attributes {dimension_semantics = [#tpu.dimension_semantics<parallel>], iteration_bounds = array<i64: 1>, scalar_prefetch = 0 : i64, scratch_operands = 0 : i64, tpu.core_type = #tpu.core_type<tc>, window_params = [{pipeline_mode = #tpu.pipeline_mode<synchronous>, transform_indices = @transform_0, window_bounds = array<i64: 128, 128>}, {transform_indices = @transform_1, window_bounds = array<i64: 128, 128>}, {pipeline_mode = #tpu.pipeline_mode<synchronous>, transform_indices = @transform_2, window_bounds = array<i64: 128, 2>}, {transform_indices = @transform_3, window_bounds = array<i64: 1, 128>}]} {
    %c0 = arith.constant 0 : index
    %c0_0 = arith.constant 0 : index
    %0 = vector.load %arg3[%c0, %c0_0] : memref<128x2xf32, #tpu.memory_space<vmem>>, vector<128x1xf32>
    %c0_1 = arith.constant 0 : index
    %c1 = arith.constant 1 : index
    %1 = vector.load %arg3[%c0_1, %c1] : memref<128x2xf32, #tpu.memory_space<vmem>>, vector<128x1xf32>
    %c0_2 = arith.constant 0 : index
    %c0_3 = arith.constant 0 : index
    %2 = vector.load %arg1[%c0_2, %c0_3] : memref<128x128xbf16, #tpu.memory_space<vmem>>, vector<128x128xbf16>
    %c0_4 = arith.constant 0 : index
    %c0_5 = arith.constant 0 : index
    %3 = vector.load %arg2[%c0_4, %c0_5] : memref<128x128xbf16, #tpu.memory_space<vmem>>, vector<128x128xbf16>
    %cst = arith.constant dense<0.000000e+00> : vector<128x128xf32>
    %4 = tpu.matmul %2, %3, %cst {dimension_numbers = #tpu.dot_dimension_numbers<[1], [0], [0], [1], [0, 0, 1, 1], [], []>} : vector<128x128xbf16>, vector<128x128xbf16>, vector<128x128xf32> -> vector<128x128xf32>
    %5 = vector.broadcast %0 : vector<128x1xf32> to vector<128x128xf32>
    %6 = arith.addf %4, %5 : vector<128x128xf32>
    %7 = math.tanh %6 : vector<128x128xf32>
    %8 = vector.broadcast %1 : vector<128x1xf32> to vector<128x128xf32>
    %9 = arith.mulf %7, %8 : vector<128x128xf32>
    %cst_6 = arith.constant dense<0.000000e+00> : vector<128xf32>
    %10 = vector.multi_reduction <add>, %9, %cst_6 [0] : vector<128x128xf32> to vector<128xf32>
    %11 = vector.shape_cast %10 : vector<128xf32> to vector<1x128xf32>
    %c0_7 = arith.constant 0 : index
    %c0_8 = arith.constant 0 : index
    %12 = vector.load %arg4[%c0_7, %c0_8] : memref<1x128xf32, #tpu.memory_space<vmem>>, vector<1x128xf32>
    tpu.vector_store %arg4[%c0_7, %c0_8], %11 {strides = array<i32>} : memref<1x128xf32, #tpu.memory_space<vmem>>, vector<1x128xf32>,
    return
  }
  func.func @transform_0(%arg0: i32) -> (i32, i32) {
    %c0_i32 = arith.constant 0 : i32
    %c0_i32_0 = arith.constant 0 : i32
    %c0_i32_1 = arith.constant 0 : i32
    return %c0_i32, %c0_i32_0 : i32, i32
  }
  func.func @transform_1(%arg0: i32) -> (i32, i32) {
    %c0_i32 = arith.constant 0 : i32
    %c0_i32_0 = arith.constant 0 : i32
    return %c0_i32, %arg0 : i32, i32
  }
  func.func @transform_2(%arg0: i32) -> (i32, i32) {
    %c0_i32 = arith.constant 0 : i32
    %c0_i32_0 = arith.constant 0 : i32
    %c0_i32_1 = arith.constant 0 : i32
    return %c0_i32, %c0_i32_0 : i32, i32
  }
  func.func @transform_3(%arg0: i32) -> (i32, i32) {
    %c0_i32 = arith.constant 0 : i32
    %c0_i32_0 = arith.constant 0 : i32
    return %c0_i32, %arg0 : i32, i32
  }
}

</mosaic_0001>

<bundles_post_ra>
// kernel: tpu_custom_call.1
= control target key start
LH: loop header
LB: loop body
LE: loop exit
PB: predicated region body
PF: predicated region fallthrough
CT: control target
= control target key end

     0   :  { %v630_v2 = vmov 0   ;;  %s767_s0 = inlined_call_operand.vmem [shape: bf16[128,128], index: 0, kind: input, shape index: {}]   ;;  %s768_s1 = inlined_call_operand.vmem [shape: bf16[128,128], index: 1, kind: input, shape index: {}]   ;;  %s769_s2 = inlined_call_operand.vmem [shape: f32[128,2], index: 2, kind: input, shape index: {}]   ;;  %s770_s3 = inlined_call_operand.hbm [shape: f32[1,128], index: 3, kind: output, shape index: {}]  }
   0x1   :  { %v558_v0 = vld [vmem:[%s768_s1] sm:$0xff]   ;;  %v559_v1 = vld [vmem:[%s768_s1 + $0x8] sm:$0xff]   ;;  %552 = vset.pattern.permute.xlu0 %v630_v2  ;;  %553 = vset.pattern.permute.xlu1 %v630_v2  ;;  %v560_v3 = vld [vmem:[%s768_s1 + $0x10] sm:$0xff]  }
   0x2   :  { %501 = vmatprep.subr.bf16.mxu0 %v558_v0  ;;  %533 = vmatprep.subr.bf16.mxu1 %v558_v0  ;;  %v561_v4 = vld [vmem:[%s768_s1 + $0x18] sm:$0xff]   ;;  %v566_v5 = vld [vmem:[%s767_s0] sm:$0xff]   ;;  %v563_v8 = vld [vmem:[%s768_s1 + $0x28] sm:$0xff]  }
   0x3   :  { %502 = vmatpush3.bf16.msra.mxu0 %v558_v0  ;;  %541 = vmatpush3.bf16.msra.mxu1 %v558_v0  ;;  %v567_v6 = vld [vmem:[%s767_s0 + $0x20] sm:$0xff]   ;;  %v18_v10 = vld [vmem:[%s769_s2 + $0x10] sm:$0xff]  ;;  %v17_v11 = vld [vmem:[%s769_s2 + $0x8] sm:$0xff] }
   0x4   :  { %503 = vmatprep.subr.bf16.mxu0 %v559_v1  ;;  %534 = vmatprep.subr.bf16.mxu1 %v559_v1  ;;  %v562_v7 = vld [vmem:[%s768_s1 + $0x20] sm:$0xff]   ;;  %v19_v12 = vld [vmem:[%s769_s2 + $0x18] sm:$0xff]  ;;  %v564_v13 = vld [vmem:[%s768_s1 + $0x30] sm:$0xff]  }
   0x5   :  { %517 = vmatprep.mubr.bf16.mxu0 %v566_v5  ;;  %525 = vmatprep.mubr.bf16.mxu1 %v567_v6  ;;  %v16_v9 = vld [vmem:[%s769_s2] sm:$0xff] }
   0x6   :  { %66 = vperm.xlu0 %552, %v16_v9   ;;  %76 = vperm.xlu1 %553, %v18_v10  }
   0x7   :  { %504 = vmatpush3.bf16.msra.mxu0 %v559_v1  ;;  %542 = vmatpush3.bf16.msra.mxu1 %v559_v1 }
   0x8   :  { %505 = vmatprep.subr.bf16.mxu0 %v560_v3  ;;  %535 = vmatprep.subr.bf16.mxu1 %v560_v3 }
   0xa   :  { %71 = vperm.xlu0 %552, %v17_v11  }
   0xb   :  { %506 = vmatpush3.bf16.msra.mxu0 %v560_v3  ;;  %543 = vmatpush3.bf16.msra.mxu1 %v560_v3 }
   0xc   :  { %507 = vmatprep.subr.bf16.mxu0 %v561_v4  ;;  %536 = vmatprep.subr.bf16.mxu1 %v561_v4 }
   0xf   :  { %508 = vmatpush3.bf16.msra.mxu0 %v561_v4  ;;  %544 = vmatpush3.bf16.msra.mxu1 %v561_v4 }
  0x10   :  { %509 = vmatprep.subr.bf16.mxu0 %v562_v7  ;;  %537 = vmatprep.subr.bf16.mxu1 %v562_v7 }
  0x13   :  { %510 = vmatpush3.bf16.msra.mxu0 %v562_v7  ;;  %545 = vmatpush3.bf16.msra.mxu1 %v562_v7 }
  0x14   :  { %511 = vmatprep.subr.bf16.mxu0 %v563_v8  ;;  %538 = vmatprep.subr.bf16.mxu1 %v563_v8 }
  0x15   :  { %8 = vsyncpa [#allocation3], 0  ;;  %v20_v14 = vld [vmem:[%s769_s2 + $0x20] sm:$0xff]  ;;  %81 = vperm.xlu1 %553, %v19_v12   ;;  %v21_v15 = vld [vmem:[%s769_s2 + $0x28] sm:$0xff]  ;;  %v631_v23 = vmov 1  }
  0x16   :  { %v565_v16 = vld [vmem:[%s768_s1 + $0x38] sm:$0xff]   ;;  %86 = vperm.xlu0 %552, %v20_v14   ;;  %v22_v17 = vld [vmem:[%s769_s2 + $0x30] sm:$0xff]  ;;  %v568_v19 = vld [vmem:[%s767_s0 + $0x8] sm:$0xff]  }
  0x17   :  { %512 = vmatpush3.bf16.msra.mxu0 %v563_v8  ;;  %546 = vmatpush3.bf16.msra.mxu1 %v563_v8  ;;  %v23_v18 = vld [vmem:[%s769_s2 + $0x38] sm:$0xff]  ;;  %v569_v20 = vld [vmem:[%s767_s0 + $0x28] sm:$0xff]   ;;  %v570_v21 = vld [vmem:[%s767_s0 + $0x10] sm:$0xff]  }
  0x18   :  { %513 = vmatprep.subr.bf16.mxu0 %v564_v13  ;;  %539 = vmatprep.subr.bf16.mxu1 %v564_v13  ;;  %v571_v22 = vld [vmem:[%s767_s0 + $0x30] sm:$0xff]   ;;  %v572_v24 = vld [vmem:[%s767_s0 + $0x18] sm:$0xff]   ;;  %v24_v26 = vld [vmem:[%s769_s2 + $0x40] sm:$0xff] }
  0x19   :  { %91 = vperm.xlu1 %553, %v21_v15   ;;  %v573_v25 = vld [vmem:[%s767_s0 + $0x38] sm:$0xff]   ;;  %v25_v27 = vld [vmem:[%s769_s2 + $0x48] sm:$0xff]  ;;  %v26_v28 = vld [vmem:[%s769_s2 + $0x50] sm:$0xff] }
  0x1a   :  { %96 = vperm.xlu0 %552, %v22_v17   ;;  %v27_v29 = vld [vmem:[%s769_s2 + $0x58] sm:$0xff]  ;;  %v28_v30 = vld [vmem:[%s769_s2 + $0x60] sm:$0xff]  ;;  %v29_v31 = vld [vmem:[%s769_s2 + $0x68] sm:$0xff] }
  0x1b   :  { %514 = vmatpush3.bf16.msra.mxu0 %v564_v13  ;;  %547 = vmatpush3.bf16.msra.mxu1 %v564_v13  ;;  %v30_v32 = vld [vmem:[%s769_s2 + $0x70] sm:$0xff]  ;;  %v31_v33 = vld [vmem:[%s769_s2 + $0x78] sm:$0xff]  ;;  %s632_s2 = smov [#allocation2]  }
  0x1c   :  { %515 = vmatprep.subr.bf16.mxu0 %v565_v16  ;;  %540 = vmatprep.subr.bf16.mxu1 %v565_v16  ;;  %s461_s20 = sshll.u32 %s632_s2, 4  ;;  %s462_s20 = int_to_ptr.vmem [resolvable:$true] %s461_s20 }
  0x1d   :  { %101 = vperm.xlu1 %553, %v23_v18   ;;  %s606_s21 = scalar_lea.vmem %s462_s20, 16  ;;  %s610_s22 = scalar_lea.vmem %s462_s20, 32 }
  0x1e   :  { %554 = vset.pattern.permute.xlu0 %v631_v23  ;;  %p607_p0 = scmp.ne.s32.totalorder %s462_s20, %s606_s21  ;;  %p611_p1 = scmp.lt.s32.totalorder %s462_s20, %s462_s20 }
  0x1f   :  { %516 = vmatpush3.bf16.msra.mxu0 %v565_v16  ;;  %548 = vmatpush3.bf16.msra.mxu1 %v565_v16  ;;  %p612_p2 = scmp.lt.s32.totalorder %s610_s22, %s606_s21 }
  0x20   :  { %354 = vperm.xlu0 %554, %v16_v9  }
  0x21   :  { %555 = vset.pattern.permute.xlu1 %v631_v23  ;;  %p613_p3 = por %p612_p2, %p611_p1 }
  0x22   :  { %518 = vmatmul.mubr.bf16.vlgmr.msra.gmra.mrb[0].mxu0 %v568_v19  ;;  %526 = vmatmul.mubr.bf16.vlgmr.msra.gmra.mrb[0].mxu1 %v569_v20 }
  0x23   :  { %521 = vmatprep.mubr.bf16.mxu0 %v570_v21  ;;  %529 = vmatprep.mubr.bf16.mxu1 %v571_v22  ;;  %p614_p4 = pnand %p613_p3, %p607_p0 }
  0x24   :  { %358 = vperm.xlu1 %555, %v17_v11   ;;  %362 = vperm.xlu0 %554, %v18_v10  }
  0x28   :  { %556 = vset.pattern.permute.xlu1 %v630_v2  ;;  %366 = vperm.xlu0 %554, %v19_v12  }
  0x29   :  { %106 = vperm.xlu1 %556, %v24_v26  }
  0x2a   :  { %522 = vmatmul.mubr.bf16.gmra.mrb[4].mxu0 %v572_v24  ;;  %530 = vmatmul.mubr.bf16.gmra.mrb[4].mxu1 %v573_v25 }
  0x2c   :  { %370 = vperm.xlu0 %554, %v20_v14  }
  0x2d   :  { %111 = vperm.xlu1 %556, %v25_v27  }
  0x30   :  { %374 = vperm.xlu0 %554, %v21_v15  }
  0x31   :  { %116 = vperm.xlu1 %556, %v26_v28  }
  0x34   :  { %378 = vperm.xlu0 %554, %v22_v17  }
  0x35   :  { %121 = vperm.xlu1 %556, %v27_v29  }
  0x38   :  { %382 = vperm.xlu0 %554, %v23_v18  }
  0x39   :  { %126 = vperm.xlu1 %556, %v28_v30  }
  0x3c   :  { %386 = vperm.xlu0 %554, %v24_v26  }
  0x3d   :  { %131 = vperm.xlu1 %556, %v29_v31  }
  0x40   :  { %390 = vperm.xlu0 %554, %v25_v27  }
  0x41   :  { %136 = vperm.xlu1 %556, %v30_v32  }
  0x44   :  { %398 = vperm.xlu0 %554, %v27_v29  }
  0x45   :  { %141 = vperm.xlu1 %556, %v31_v33  }
  0x48   :  { %406 = vperm.xlu0 %554, %v29_v31  }
  0x49   :  { %557 = vset.pattern.permute.xlu1 %v631_v23 }
  0x4a   :  { %394 = vperm.xlu1 %557, %v26_v28  }
  0x4c   :  { %414 = vperm.xlu0 %554, %v31_v33  }
  0x4e   :  { %402 = vperm.xlu1 %557, %v28_v30  }
  0x52   :  { %410 = vperm.xlu1 %557, %v30_v32  }
  0x85   :  { %v67_v34 = vpop.permute.xlu0 %66  ;;  %v77_v35 = vpop.permute.xlu1 %76 }
  0x89   :  { %v72_v36 = vpop.permute.xlu0 %71 }
  0x94   :  { %v82_v37 = vpop.permute.xlu1 %81 }
  0x95   :  { %v87_v38 = vpop.permute.xlu0 %86 }
  0x98   :  { %v92_v39 = vpop.permute.xlu1 %91 }
  0x99   :  { %v97_v40 = vpop.permute.xlu0 %96 }
  0x9c   :  { %v102_v41 = vpop.permute.xlu1 %101 }
  0x9f   :  { %v355_v42 = vpop.permute.xlu0 %354 }
  0xa3   :  { %v359_v43 = vpop.permute.xlu1 %358  ;;  %v363_v44 = vpop.permute.xlu0 %362 }
  0xa7   :  { %v367_v46 = vpop.permute.xlu0 %366 }
  0xa8   :  { %v107_v45 = vpop.permute.xlu1 %106 }
  0xab   :  { %v371_v48 = vpop.permute.xlu0 %370 }
  0xac   :  { %v112_v47 = vpop.permute.xlu1 %111 }
  0xaf   :  { %v752_v50 = vpop.permute.xlu0 %374 }
  0xb0   :  { %v117_v49 = vpop.permute.xlu1 %116 }
  0xb3   :  { %v379_v63 = vpop.permute.xlu0 %378 }
  0xb4   :  { %v122_v51 = vpop.permute.xlu1 %121 }
  0xb7   :  { %v383_v16 = vpop.permute.xlu0 %382 }
  0xb8   :  { %v127_v0 = vpop.permute.xlu1 %126 }
  0xbb   :  { %v387_v29 = vpop.permute.xlu0 %386 }
  0xbc   :  { %v132_v13 = vpop.permute.xlu1 %131 }
  0xc0   :  { %v137_v24 = vpop.permute.xlu1 %136 }
  0xf5   :  { %v519_v52 = vpop.f32.mrb[0].mxu0  ;;  %v527_v53 = vpop.f32.mrb[0].mxu1 }
  0xf6   :  { %v274_v54 = vpop.f32.mrb[1].mxu0  ;;  %v306_v55 = vpop.f32.mrb[1].mxu1  ;;  %v283_v61 = vadd.f32 %v519_v52, %v77_v35  ;;  %v315_v25 = vadd.f32 %v527_v53, %v117_v49 }
  0xf7   :  { %v520_v56 = vpop.f32.mrb[2].mxu0  ;;  %v528_v57 = vpop.f32.mrb[2].mxu1  ;;  %v275_v58 = vadd.f32 %v274_v54, %v67_v34  ;;  %v307_v17 = vadd.f32 %v306_v55, %v107_v45 }
  0xf8   :  { %v277_v59 = vpop.f32.mrb[3].mxu0  ;;  %v309_v60 = vpop.f32.mrb[3].mxu1  ;;  %v286_v1 = vadd.f32 %v520_v56, %v82_v37  ;;  %v318_v30 = vadd.f32 %v528_v57, %v122_v51 }
  0xf9   :  { %v278_v62 = vadd.f32 %v277_v59, %v72_v36  ;;  %574 = vtanh.f32 %v275_v58  ;;  %v310_v20 = vadd.f32 %v309_v60, %v112_v47 }
  0xfa   :  { %576 = vtanh.f32 %v283_v61 }
  0xfb   :  { %578 = vtanh.f32 %v278_v62 }
  0xfc   :  { %580 = vtanh.f32 %v286_v1 }
  0xfd   :  { %v523_v2 = vpop.f32.mrb[4].mxu0  ;;  %v531_v3 = vpop.f32.mrb[4].mxu1 }
  0xfe   :  { %v290_v4 = vpop.f32.mrb[5].mxu0  ;;  %v322_v5 = vpop.f32.mrb[5].mxu1  ;;  %v299_v11 = vadd.f32 %v523_v2, %v97_v40 }
  0xff   :  { %v291_v6 = vadd.f32 %v290_v4, %v87_v38  ;;  %v524_v7 = vpop.f32.mrb[6].mxu0  ;;  %v532_v8 = vpop.f32.mrb[6].mxu1  ;;  %v323_v34 = vadd.f32 %v322_v5, %v127_v0 }
 0x100   :  { %v293_v9 = vpop.f32.mrb[7].mxu0  ;;  %v325_v10 = vpop.f32.mrb[7].mxu1  ;;  %v302_v14 = vadd.f32 %v524_v7, %v102_v41 }
 0x101   :  { %582 = vtanh.f32 %v291_v6  ;;  %v294_v12 = vadd.f32 %v293_v9, %v92_v39  ;;  %v142_v38 = vpop.permute.xlu1 %141  ;;  %v326_v39 = vadd.f32 %v325_v10, %v132_v13 }
 0x102   :  { %584 = vtanh.f32 %v299_v11  ;;  %v334_v49 = vadd.f32 %v532_v8, %v142_v38 }
 0x103   :  { %v575_v15 = vpop.eup %574  ;;  %586 = vtanh.f32 %v294_v12 }
 0x104   :  { %v577_v18 = vpop.eup %576  ;;  %588 = vtanh.f32 %v302_v14  ;;  %v417_v21 = vmul.f32 %v575_v15, %v355_v42 }
 0x105   :  { %v579_v19 = vpop.eup %578  ;;  %590 = vtanh.f32 %v307_v17  ;;  %v419_v26 = vmul.f32 %v577_v18, %v363_v44  ;;  %v331_v44 = vadd.f32 %v531_v3, %v137_v24 }
 0x106   :  { %v418_v22 = vmul.f32 %v579_v19, %v359_v43  ;;  %v581_v23 = vpop.eup %580  ;;  %592 = vtanh.f32 %v310_v20  ;;  %v391_v43 = vpop.permute.xlu0 %390 }
 0x107   :  { %v420_v31 = vmul.f32 %v581_v23, %v367_v46  ;;  %594 = vtanh.f32 %v315_v25 }
 0x108   :  { %v433_v27 = vadd.f32 %v418_v22, %v417_v21  ;;  %596 = vtanh.f32 %v318_v30 }
 0x109   :  { %598 = vtanh.f32 %v323_v34 }
 0x10a   :  { %v434_v32 = vadd.f32 %v433_v27, %v419_v26  ;;  %600 = vtanh.f32 %v326_v39  ;;  %v399_v57 = vpop.permute.xlu0 %398 }
 0x10b   :  { %v583_v28 = vpop.eup %582  ;;  %602 = vtanh.f32 %v331_v44 }
 0x10c   :  { %v421_v33 = vmul.f32 %v583_v28, %v371_v48  ;;  %v585_v35 = vpop.eup %584  ;;  %v435_v36 = vadd.f32 %v434_v32, %v420_v31  ;;  %v395_v48 = vpop.permute.xlu1 %394  ;;  %604 = vtanh.f32 %v334_v49 }
 0x10d   :  { %v587_v37 = vpop.eup %586  ;;  %v423_v45 = vmul.f32 %v585_v35, %v379_v63 }
 0x10e   :  { %v436_v40 = vadd.f32 %v435_v36, %v421_v33  ;;  %v422_v41 = vmul.f32 %v587_v37, %v752_v50  ;;  %v589_v42 = vpop.eup %588  ;;  %v407_v3 = vpop.permute.xlu0 %406 }
 0x10f   :  { %v591_v46 = vpop.eup %590  ;;  %v424_v51 = vmul.f32 %v589_v42, %v383_v16 }
 0x110   :  { %v437_v47 = vadd.f32 %v436_v40, %v422_v41  ;;  %v593_v53 = vpop.eup %592  ;;  %v425_v54 = vmul.f32 %v591_v46, %v387_v29  ;;  %v403_v60 = vpop.permute.xlu1 %402 }
 0x111   :  { %v595_v56 = vpop.eup %594  ;;  %v426_v50 = vmul.f32 %v593_v53, %v391_v43 }
 0x112   :  { %v438_v52 = vadd.f32 %v437_v47, %v423_v45  ;;  %v597_v59 = vpop.eup %596  ;;  %v427_v61 = vmul.f32 %v595_v56, %v395_v48  ;;  %v415_v13 = vpop.permute.xlu0 %414 }
 0x113   :  { %v599_v63 = vpop.eup %598  ;;  %v428_v1 = vmul.f32 %v597_v59, %v399_v57 }
 0x114   :  { %v439_v55 = vadd.f32 %v438_v52, %v424_v51  ;;  %v601_v2 = vpop.eup %600  ;;  %v429_v4 = vmul.f32 %v599_v63, %v403_v60  ;;  %v411_v7 = vpop.permute.xlu1 %410 }
 0x115   :  { %v603_v6 = vpop.eup %602  ;;  %v430_v9 = vmul.f32 %v601_v2, %v407_v3 }
 0x116   :  { %v440_v58 = vadd.f32 %v439_v55, %v425_v54  ;;  %v605_v10 = vpop.eup %604  ;;  %v431_v11 = vmul.f32 %v603_v6, %v411_v7 }
 0x117   :  { %v432_v14 = vmul.f32 %v605_v10, %v415_v13 }
 0x118   :  { %v441_v62 = vadd.f32 %v440_v58, %v426_v50 }
 0x11a   :  { %v442_v0 = vadd.f32 %v441_v62, %v427_v61 }
 0x11c   :  { %v443_v5 = vadd.f32 %v442_v0, %v428_v1 }
 0x11e   :  { %v444_v8 = vadd.f32 %v443_v5, %v429_v4 }
 0x120   :  { %v445_v12 = vadd.f32 %v444_v8, %v430_v9 }
 0x122   :  { %v446_v15 = vadd.f32 %v445_v12, %v431_v11 }
 0x124   :  { %v447_v16 = vadd.f32 %v446_v15, %v432_v14 }
 0x126   :  { %v448_v17 = vrot.slane %v447_v16, 4 }
 0x128   :  { %v449_v18 = vadd.f32 %v448_v17, %v447_v16 }
 0x12a   :  { %v450_v19 = vrot.slane %v449_v18, 2 }
 0x12c   :  { %v451_v20 = vadd.f32 %v450_v19, %v449_v18 }
 0x12e   :  { %v452_v21 = vrot.slane %v451_v20, 1 }
 0x130   :  { %v453_v22 = vadd.f32 %v452_v21, %v451_v20 }
 0x132   :  { %454 = vst [vmem:[#allocation2] sm:$0x1] %v453_v22 }
 0x133   :  { %617 = shalt.err (!%p614_p4)
}
 0x134   :  { %s618_s24 = scalar_lea.hbm %s770_s3, 16 }
 0x135   :  { %p619_p5 = scmp.ne.s32.totalorder %s770_s3, %s618_s24  ;;  %p622_p6 = scmp.lt.u32.totalorder %s618_s24, %s770_s3 }
 0x137   :  { %p624_p7 = pnand %p622_p6, %p619_p5 }
 0x139   :  { %627 = shalt.err (!%p624_p7)
}
 0x13a   :  { %464 = dma.vmem_to_hbm [thread:$0]  %s462_s20, 16, %s770_s3, [#allocation3]  }
 0x13b   :  { %628 = dma.done.wait [#allocation3], 16  }
 0x13c   :  { %629 = vsyncadd [#allocation3], 4294967280 }
 0x13d   :  { %468 = vsyncpa [#allocation3], 1 }

// kernel: tpu_custom_call.1
= control target key start
LH: loop header
LB: loop body
LE: loop exit
PB: predicated region body
PF: predicated region fallthrough
CT: control target
= control target key end

     0   :  { %v630_v2 = vmov 0   ;;  %s767_s0 = inlined_call_operand.vmem [shape: bf16[128,128], index: 0, kind: input, shape index: {}]   ;;  %s768_s1 = inlined_call_operand.vmem [shape: bf16[128,128], index: 1, kind: input, shape index: {}]   ;;  %s769_s2 = inlined_call_operand.vmem [shape: f32[128,2], index: 2, kind: input, shape index: {}]   ;;  %s770_s3 = inlined_call_operand.hbm [shape: f32[1,128], index: 3, kind: output, shape index: {}]  }
   0x1   :  { %v558_v0 = vld [vmem:[%s768_s1] sm:$0xff]   ;;  %v559_v1 = vld [vmem:[%s768_s1 + $0x8] sm:$0xff]   ;;  %552 = vset.pattern.permute.xlu0 %v630_v2  ;;  %553 = vset.pattern.permute.xlu1 %v630_v2  ;;  %v560_v3 = vld [vmem:[%s768_s1 + $0x10] sm:$0xff]  }
   0x2   :  { %501 = vmatprep.subr.bf16.mxu0 %v558_v0  ;;  %533 = vmatprep.subr.bf16.mxu1 %v558_v0  ;;  %v561_v4 = vld [vmem:[%s768_s1 + $0x18] sm:$0xff]   ;;  %v566_v5 = vld [vmem:[%s767_s0] sm:$0xff]   ;;  %v563_v8 = vld [vmem:[%s768_s1 + $0x28] sm:$0xff]  }
   0x3   :  { %502 = vmatpush3.bf16.msra.mxu0 %v558_v0  ;;  %541 = vmatpush3.bf16.msra.mxu1 %v558_v0  ;;  %v567_v6 = vld [vmem:[%s767_s0 + $0x20] sm:$0xff]   ;;  %v18_v10 = vld [vmem:[%s769_s2 + $0x10] sm:$0xff]  ;;  %v17_v11 = vld [vmem:[%s769_s2 + $0x8] sm:$0xff] }
   0x4   :  { %503 = vmatprep.subr.bf16.mxu0 %v559_v1  ;;  %534 = vmatprep.subr.bf16.mxu1 %v559_v1  ;;  %v562_v7 = vld [vmem:[%s768_s1 + $0x20] sm:$0xff]   ;;  %v19_v12 = vld [vmem:[%s769_s2 + $0x18] sm:$0xff]  ;;  %v564_v13 = vld [vmem:[%s768_s1 + $0x30] sm:$0xff]  }
   0x5   :  { %517 = vmatprep.mubr.bf16.mxu0 %v566_v5  ;;  %525 = vmatprep.mubr.bf16.mxu1 %v567_v6  ;;  %v16_v9 = vld [vmem:[%s769_s2] sm:$0xff] }
   0x6   :  { %66 = vperm.xlu0 %552, %v16_v9   ;;  %76 = vperm.xlu1 %553, %v18_v10  }
   0x7   :  { %504 = vmatpush3.bf16.msra.mxu0 %v559_v1  ;;  %542 = vmatpush3.bf16.msra.mxu1 %v559_v1 }
   0x8   :  { %505 = vmatprep.subr.bf16.mxu0 %v560_v3  ;;  %535 = vmatprep.subr.bf16.mxu1 %v560_v3 }
   0xa   :  { %71 = vperm.xlu0 %552, %v17_v11  }
   0xb   :  { %506 = vmatpush3.bf16.msra.mxu0 %v560_v3  ;;  %543 = vmatpush3.bf16.msra.mxu1 %v560_v3 }
   0xc   :  { %507 = vmatprep.subr.bf16.mxu0 %v561_v4  ;;  %536 = vmatprep.subr.bf16.mxu1 %v561_v4 }
   0xf   :  { %508 = vmatpush3.bf16.msra.mxu0 %v561_v4  ;;  %544 = vmatpush3.bf16.msra.mxu1 %v561_v4 }
  0x10   :  { %509 = vmatprep.subr.bf16.mxu0 %v562_v7  ;;  %537 = vmatprep.subr.bf16.mxu1 %v562_v7 }
  0x13   :  { %510 = vmatpush3.bf16.msra.mxu0 %v562_v7  ;;  %545 = vmatpush3.bf16.msra.mxu1 %v562_v7 }
  0x14   :  { %511 = vmatprep.subr.bf16.mxu0 %v563_v8  ;;  %538 = vmatprep.subr.bf16.mxu1 %v563_v8 }
  0x15   :  { %8 = vsyncpa [#allocation3], 0  ;;  %v20_v14 = vld [vmem:[%s769_s2 + $0x20] sm:$0xff]  ;;  %81 = vperm.xlu1 %553, %v19_v12   ;;  %v21_v15 = vld [vmem:[%s769_s2 + $0x28] sm:$0xff]  ;;  %v631_v23 = vmov 1  }
  0x16   :  { %v565_v16 = vld [vmem:[%s768_s1 + $0x38] sm:$0xff]   ;;  %86 = vperm.xlu0 %552, %v20_v14   ;;  %v22_v17 = vld [vmem:[%s769_s2 + $0x30] sm:$0xff]  ;;  %v568_v19 = vld [vmem:[%s767_s0 + $0x8] sm:$0xff]  }
  0x17   :  { %512 = vmatpush3.bf16.msra.mxu0 %v563_v8  ;;  %546 = vmatpush3.bf16.msra.mxu1 %v563_v8  ;;  %v23_v18 = vld [vmem:[%s769_s2 + $0x38] sm:$0xff]  ;;  %v569_v20 = vld [vmem:[%s767_s0 + $0x28] sm:$0xff]   ;;  %v570_v21 = vld [vmem:[%s767_s0 + $0x10] sm:$0xff]  }
  0x18   :  { %513 = vmatprep.subr.bf16.mxu0 %v564_v13  ;;  %539 = vmatprep.subr.bf16.mxu1 %v564_v13  ;;  %v571_v22 = vld [vmem:[%s767_s0 + $0x30] sm:$0xff]   ;;  %v572_v24 = vld [vmem:[%s767_s0 + $0x18] sm:$0xff]   ;;  %v24_v26 = vld [vmem:[%s769_s2 + $0x40] sm:$0xff] }
  0x19   :  { %91 = vperm.xlu1 %553, %v21_v15   ;;  %v573_v25 = vld [vmem:[%s767_s0 + $0x38] sm:$0xff]   ;;  %v25_v27 = vld [vmem:[%s769_s2 + $0x48] sm:$0xff]  ;;  %v26_v28 = vld [vmem:[%s769_s2 + $0x50] sm:$0xff] }
  0x1a   :  { %96 = vperm.xlu0 %552, %v22_v17   ;;  %v27_v29 = vld [vmem:[%s769_s2 + $0x58] sm:$0xff]  ;;  %v28_v30 = vld [vmem:[%s769_s2 + $0x60] sm:$0xff]  ;;  %v29_v31 = vld [vmem:[%s769_s2 + $0x68] sm:$0xff] }
  0x1b   :  { %514 = vmatpush3.bf16.msra.mxu0 %v564_v13  ;;  %547 = vmatpush3.bf16.msra.mxu1 %v564_v13  ;;  %v30_v32 = vld [vmem:[%s769_s2 + $0x70] sm:$0xff]  ;;  %v31_v33 = vld [vmem:[%s769_s2 + $0x78] sm:$0xff]  ;;  %s632_s2 = smov [#allocation2]  }
  0x1c   :  { %515 = vmatprep.subr.bf16.mxu0 %v565_v16  ;;  %540 = vmatprep.subr.bf16.mxu1 %v565_v16  ;;  %s461_s20 = sshll.u32 %s632_s2, 4  ;;  %s462_s20 = int_to_ptr.vmem [resolvable:$true] %s461_s20 }
  0x1d   :  { %101 = vperm.xlu1 %553, %v23_v18   ;;  %s606_s21 = scalar_lea.vmem %s462_s20, 16  ;;  %s610_s22 = scalar_lea.vmem %s462_s20, 32 }
  0x1e   :  { %554 = vset.pattern.permute.xlu0 %v631_v23  ;;  %p607_p0 = scmp.ne.s32.totalorder %s462_s20, %s606_s21  ;;  %p611_p1 = scmp.lt.s32.totalorder %s462_s20, %s462_s20 }
  0x1f   :  { %516 = vmatpush3.bf16.msra.mxu0 %v565_v16  ;;  %548 = vmatpush3.bf16.msra.mxu1 %v565_v16  ;;  %p612_p2 = scmp.lt.s32.totalorder %s610_s22, %s606_s21 }
  0x20   :  { %354 = vperm.xlu0 %554, %v16_v9  }
  0x21   :  { %555 = vset.pattern.permute.xlu1 %v631_v23  ;;  %p613_p3 = por %p612_p2, %p611_p1 }
  0x22   :  { %518 = vmatmul.mubr.bf16.vlgmr.msra.gmra.mrb[0].mxu0 %v568_v19  ;;  %526 = vmatmul.mubr.bf16.vlgmr.msra.gmra.mrb[0].mxu1 %v569_v20 }
  0x23   :  { %521 = vmatprep.mubr.bf16.mxu0 %v570_v21  ;;  %529 = vmatprep.mubr.bf16.mxu1 %v571_v22  ;;  %p614_p4 = pnand %p613_p3, %p607_p0 }
  0x24   :  { %358 = vperm.xlu1 %555, %v17_v11   ;;  %362 = vperm.xlu0 %554, %v18_v10  }
  0x28   :  { %556 = vset.pattern.permute.xlu1 %v630_v2  ;;  %366 = vperm.xlu0 %554, %v19_v12  }
  0x29   :  { %106 = vperm.xlu1 %556, %v24_v26  }
  0x2a   :  { %522 = vmatmul.mubr.bf16.gmra.mrb[4].mxu0 %v572_v24  ;;  %530 = vmatmul.mubr.bf16.gmra.mrb[4].mxu1 %v573_v25 }
  0x2c   :  { %370 = vperm.xlu0 %554, %v20_v14  }
  0x2d   :  { %111 = vperm.xlu1 %556, %v25_v27  }
  0x30   :  { %374 = vperm.xlu0 %554, %v21_v15  }
  0x31   :  { %116 = vperm.xlu1 %556, %v26_v28  }
  0x34   :  { %378 = vperm.xlu0 %554, %v22_v17  }
  0x35   :  { %121 = vperm.xlu1 %556, %v27_v29  }
  0x38   :  { %382 = vperm.xlu0 %554, %v23_v18  }
  0x39   :  { %126 = vperm.xlu1 %556, %v28_v30  }
  0x3c   :  { %386 = vperm.xlu0 %554, %v24_v26  }
  0x3d   :  { %131 = vperm.xlu1 %556, %v29_v31  }
  0x40   :  { %390 = vperm.xlu0 %554, %v25_v27  }
  0x41   :  { %136 = vperm.xlu1 %556, %v30_v32  }
  0x44   :  { %398 = vperm.xlu0 %554, %v27_v29  }
  0x45   :  { %141 = vperm.xlu1 %556, %v31_v33  }
  0x48   :  { %406 = vperm.xlu0 %554, %v29_v31  }
  0x49   :  { %557 = vset.pattern.permute.xlu1 %v631_v23 }
  0x4a   :  { %394 = vperm.xlu1 %557, %v26_v28  }
  0x4c   :  { %414 = vperm.xlu0 %554, %v31_v33  }
  0x4e   :  { %402 = vperm.xlu1 %557, %v28_v30  }
  0x52   :  { %410 = vperm.xlu1 %557, %v30_v32  }
  0x85   :  { %v67_v34 = vpop.permute.xlu0 %66  ;;  %v77_v35 = vpop.permute.xlu1 %76 }
  0x89   :  { %v72_v36 = vpop.permute.xlu0 %71 }
  0x94   :  { %v82_v37 = vpop.permute.xlu1 %81 }
  0x95   :  { %v87_v38 = vpop.permute.xlu0 %86 }
  0x98   :  { %v92_v39 = vpop.permute.xlu1 %91 }
  0x99   :  { %v97_v40 = vpop.permute.xlu0 %96 }
  0x9c   :  { %v102_v41 = vpop.permute.xlu1 %101 }
  0x9f   :  { %v355_v42 = vpop.permute.xlu0 %354 }
  0xa3   :  { %v359_v43 = vpop.permute.xlu1 %358  ;;  %v363_v44 = vpop.permute.xlu0 %362 }
  0xa7   :  { %v367_v46 = vpop.permute.xlu0 %366 }
  0xa8   :  { %v107_v45 = vpop.permute.xlu1 %106 }
  0xab   :  { %v371_v48 = vpop.permute.xlu0 %370 }
  0xac   :  { %v112_v47 = vpop.permute.xlu1 %111 }
  0xaf   :  { %v752_v50 = vpop.permute.xlu0 %374 }
  0xb0   :  { %v117_v49 = vpop.permute.xlu1 %116 }
  0xb3   :  { %v379_v63 = vpop.permute.xlu0 %378 }
  0xb4   :  { %v122_v51 = vpop.permute.xlu1 %121 }
  0xb7   :  { %v383_v16 = vpop.permute.xlu0 %382 }
  0xb8   :  { %v127_v0 = vpop.permute.xlu1 %126 }
  0xbb   :  { %v387_v29 = vpop.permute.xlu0 %386 }
  0xbc   :  { %v132_v13 = vpop.permute.xlu1 %131 }
  0xc0   :  { %v137_v24 = vpop.permute.xlu1 %136 }
  0xf5   :  { %v519_v52 = vpop.f32.mrb[0].mxu0  ;;  %v527_v53 = vpop.f32.mrb[0].mxu1 }
  0xf6   :  { %v274_v54 = vpop.f32.mrb[1].mxu0  ;;  %v306_v55 = vpop.f32.mrb[1].mxu1  ;;  %v283_v61 = vadd.f32 %v519_v52, %v77_v35  ;;  %v315_v25 = vadd.f32 %v527_v53, %v117_v49 }
  0xf7   :  { %v520_v56 = vpop.f32.mrb[2].mxu0  ;;  %v528_v57 = vpop.f32.mrb[2].mxu1  ;;  %v275_v58 = vadd.f32 %v274_v54, %v67_v34  ;;  %v307_v17 = vadd.f32 %v306_v55, %v107_v45 }
  0xf8   :  { %v277_v59 = vpop.f32.mrb[3].mxu0  ;;  %v309_v60 = vpop.f32.mrb[3].mxu1  ;;  %v286_v1 = vadd.f32 %v520_v56, %v82_v37  ;;  %v318_v30 = vadd.f32 %v528_v57, %v122_v51 }
  0xf9   :  { %v278_v62 = vadd.f32 %v277_v59, %v72_v36  ;;  %574 = vtanh.f32 %v275_v58  ;;  %v310_v20 = vadd.f32 %v309_v60, %v112_v47 }
  0xfa   :  { %576 = vtanh.f32 %v283_v61 }
  0xfb   :  { %578 = vtanh.f32 %v278_v62 }
  0xfc   :  { %580 = vtanh.f32 %v286_v1 }
  0xfd   :  { %v523_v2 = vpop.f32.mrb[4].mxu0  ;;  %v531_v3 = vpop.f32.mrb[4].mxu1 }
  0xfe   :  { %v290_v4 = vpop.f32.mrb[5].mxu0  ;;  %v322_v5 = vpop.f32.mrb[5].mxu1  ;;  %v299_v11 = vadd.f32 %v523_v2, %v97_v40 }
  0xff   :  { %v291_v6 = vadd.f32 %v290_v4, %v87_v38  ;;  %v524_v7 = vpop.f32.mrb[6].mxu0  ;;  %v532_v8 = vpop.f32.mrb[6].mxu1  ;;  %v323_v34 = vadd.f32 %v322_v5, %v127_v0 }
 0x100   :  { %v293_v9 = vpop.f32.mrb[7].mxu0  ;;  %v325_v10 = vpop.f32.mrb[7].mxu1  ;;  %v302_v14 = vadd.f32 %v524_v7, %v102_v41 }
 0x101   :  { %582 = vtanh.f32 %v291_v6  ;;  %v294_v12 = vadd.f32 %v293_v9, %v92_v39  ;;  %v142_v38 = vpop.permute.xlu1 %141  ;;  %v326_v39 = vadd.f32 %v325_v10, %v132_v13 }
 0x102   :  { %584 = vtanh.f32 %v299_v11  ;;  %v334_v49 = vadd.f32 %v532_v8, %v142_v38 }
 0x103   :  { %v575_v15 = vpop.eup %574  ;;  %586 = vtanh.f32 %v294_v12 }
 0x104   :  { %v577_v18 = vpop.eup %576  ;;  %588 = vtanh.f32 %v302_v14  ;;  %v417_v21 = vmul.f32 %v575_v15, %v355_v42 }
 0x105   :  { %v579_v19 = vpop.eup %578  ;;  %590 = vtanh.f32 %v307_v17  ;;  %v419_v26 = vmul.f32 %v577_v18, %v363_v44  ;;  %v331_v44 = vadd.f32 %v531_v3, %v137_v24 }
 0x106   :  { %v418_v22 = vmul.f32 %v579_v19, %v359_v43  ;;  %v581_v23 = vpop.eup %580  ;;  %592 = vtanh.f32 %v310_v20  ;;  %v391_v43 = vpop.permute.xlu0 %390 }
 0x107   :  { %v420_v31 = vmul.f32 %v581_v23, %v367_v46  ;;  %594 = vtanh.f32 %v315_v25 }
 0x108   :  { %v433_v27 = vadd.f32 %v418_v22, %v417_v21  ;;  %596 = vtanh.f32 %v318_v30 }
 0x109   :  { %598 = vtanh.f32 %v323_v34 }
 0x10a   :  { %v434_v32 = vadd.f32 %v433_v27, %v419_v26  ;;  %600 = vtanh.f32 %v326_v39  ;;  %v399_v57 = vpop.permute.xlu0 %398 }
 0x10b   :  { %v583_v28 = vpop.eup %582  ;;  %602 = vtanh.f32 %v331_v44 }
 0x10c   :  { %v421_v33 = vmul.f32 %v583_v28, %v371_v48  ;;  %v585_v35 = vpop.eup %584  ;;  %v435_v36 = vadd.f32 %v434_v32, %v420_v31  ;;  %v395_v48 = vpop.permute.xlu1 %394  ;;  %604 = vtanh.f32 %v334_v49 }
 0x10d   :  { %v587_v37 = vpop.eup %586  ;;  %v423_v45 = vmul.f32 %v585_v35, %v379_v63 }
 0x10e   :  { %v436_v40 = vadd.f32 %v435_v36, %v421_v33  ;;  %v422_v41 = vmul.f32 %v587_v37, %v752_v50  ;;  %v589_v42 = vpop.eup %588  ;;  %v407_v3 = vpop.permute.xlu0 %406 }
 0x10f   :  { %v591_v46 = vpop.eup %590  ;;  %v424_v51 = vmul.f32 %v589_v42, %v383_v16 }
 0x110   :  { %v437_v47 = vadd.f32 %v436_v40, %v422_v41  ;;  %v593_v53 = vpop.eup %592  ;;  %v425_v54 = vmul.f32 %v591_v46, %v387_v29  ;;  %v403_v60 = vpop.permute.xlu1 %402 }
 0x111   :  { %v595_v56 = vpop.eup %594  ;;  %v426_v50 = vmul.f32 %v593_v53, %v391_v43 }
 0x112   :  { %v438_v52 = vadd.f32 %v437_v47, %v423_v45  ;;  %v597_v59 = vpop.eup %596  ;;  %v427_v61 = vmul.f32 %v595_v56, %v395_v48  ;;  %v415_v13 = vpop.permute.xlu0 %414 }
 0x113   :  { %v599_v63 = vpop.eup %598  ;;  %v428_v1 = vmul.f32 %v597_v59, %v399_v57 }
 0x114   :  { %v439_v55 = vadd.f32 %v438_v52, %v424_v51  ;;  %v601_v2 = vpop.eup %600  ;;  %v429_v4 = vmul.f32 %v599_v63, %v403_v60  ;;  %v411_v7 = vpop.permute.xlu1 %410 }
 0x115   :  { %v603_v6 = vpop.eup %602  ;;  %v430_v9 = vmul.f32 %v601_v2, %v407_v3 }
 0x116   :  { %v440_v58 = vadd.f32 %v439_v55, %v425_v54  ;;  %v605_v10 = vpop.eup %604  ;;  %v431_v11 = vmul.f32 %v603_v6, %v411_v7 }
 0x117   :  { %v432_v14 = vmul.f32 %v605_v10, %v415_v13 }
 0x118   :  { %v441_v62 = vadd.f32 %v440_v58, %v426_v50 }
 0x11a   :  { %v442_v0 = vadd.f32 %v441_v62, %v427_v61 }
 0x11c   :  { %v443_v5 = vadd.f32 %v442_v0, %v428_v1 }
 0x11e   :  { %v444_v8 = vadd.f32 %v443_v5, %v429_v4 }
 0x120   :  { %v445_v12 = vadd.f32 %v444_v8, %v430_v9 }
 0x122   :  { %v446_v15 = vadd.f32 %v445_v12, %v431_v11 }
 0x124   :  { %v447_v16 = vadd.f32 %v446_v15, %v432_v14 }
 0x126   :  { %v448_v17 = vrot.slane %v447_v16, 4 }
 0x128   :  { %v449_v18 = vadd.f32 %v448_v17, %v447_v16 }
 0x12a   :  { %v450_v19 = vrot.slane %v449_v18, 2 }
 0x12c   :  { %v451_v20 = vadd.f32 %v450_v19, %v449_v18 }
 0x12e   :  { %v452_v21 = vrot.slane %v451_v20, 1 }
 0x130   :  { %v453_v22 = vadd.f32 %v452_v21, %v451_v20 }
 0x132   :  { %454 = vst [vmem:[#allocation2] sm:$0x1] %v453_v22 }
 0x133   :  { %617 = shalt.err (!%p614_p4)
}
 0x134   :  { %s618_s24 = scalar_lea.hbm %s770_s3, 16 }
 0x135   :  { %p619_p5 = scmp.ne.s32.totalorder %s770_s3, %s618_s24  ;;  %p622_p6 = scmp.lt.u32.totalorder %s618_s24, %s770_s3 }
 0x137   :  { %p624_p7 = pnand %p622_p6, %p619_p5 }
 0x139   :  { %627 = shalt.err (!%p624_p7)
}
 0x13a   :  { %464 = dma.vmem_to_hbm [thread:$0]  %s462_s20, 16, %s770_s3, [#allocation3]  }
 0x13b   :  { %628 = dma.done.wait [#allocation3], 16  }
 0x13c   :  { %629 = vsyncadd [#allocation3], 4294967280 }
 0x13d   :  { %468 = vsyncpa [#allocation3], 1 }

</bundles_post_ra>
